<compile_context>
chip_gen: v7x
topology: tpu7x:2x2x1
jax: 0.10.0
libtpu: 0.0.40
codegen_flags: <defaults>
</compile_context>

<pallas_src>
import math
import numpy as np
import jax
import jax.numpy as jnp
from jax import lax
from jax.experimental import pallas as pl
from jax.experimental.pallas import tpu as pltpu


def _round_up(x, m):
    return ((x + m - 1) // m) * m


def _vmem_limit_bytes():
    """Per-generation VMEM scoped limit (v7x-safe fallback if the query fails)."""
    cap = 64 * 1024 * 1024          # v7x physical VMEM per TensorCore
    try:
        info = pltpu.get_tpu_info()
        got = getattr(info, "vmem_capacity_bytes", None)
        if got:
            cap = int(got)          # 128 MiB on v5e / v6e
    except Exception:
        pass
    return (cap * 3) // 4


# --------------------------------------------------------------------------- #
# Linear projection kernel (used once for the hoisted K projection)            #
# --------------------------------------------------------------------------- #
def _make_linear_kernel(mxu_dtype, precision):
    def kernel(x_ref, w_ref, b_ref, o_ref):
        acc = jnp.dot(x_ref[...].astype(mxu_dtype), w_ref[...].astype(mxu_dtype),
                      preferred_element_type=jnp.float32, precision=precision)
        o_ref[...] = (acc + b_ref[...].astype(jnp.float32)).astype(o_ref.dtype)
    return kernel


def linear_forward(x2d, w, b, *, out_dtype, mxu_dtype, precision, block_m=512):
    """y = x2d @ w + b (rows tiled; single block for small problems)."""
    m, in_dim = x2d.shape
    out_dim = w.shape[1]
    if m <= block_m:
        bm, m_pad = m, m
    else:
        bm = _round_up(block_m, 8)
        m_pad = _round_up(m, bm)
    if m_pad != m:
        x2d = jnp.pad(x2d, ((0, m_pad - m), (0, 0)))

    isz = lambda a: jnp.dtype(a.dtype).itemsize
    cost = pl.CostEstimate(
        flops=int(2 * m_pad * in_dim * out_dim),
        transcendentals=0,
        bytes_accessed=int(x2d.size * isz(x2d) + w.size * isz(w) + b.size * isz(b)
                           + m_pad * out_dim * jnp.dtype(out_dtype).itemsize))

    y = pl.pallas_call(
        _make_linear_kernel(mxu_dtype, precision),
        out_shape=jax.ShapeDtypeStruct((m_pad, out_dim), out_dtype),
        grid=(m_pad // bm,),
        in_specs=[pl.BlockSpec((bm, in_dim), lambda i: (i, 0)),
                  pl.BlockSpec((in_dim, out_dim), lambda i: (0, 0)),
                  pl.BlockSpec((1, out_dim), lambda i: (0, 0))],
        out_specs=pl.BlockSpec((bm, out_dim), lambda i: (i, 0)),
        compiler_params=pltpu.CompilerParams(
            dimension_semantics=("parallel",),
            vmem_limit_bytes=_vmem_limit_bytes()),
        cost_estimate=cost,
    )(x2d, w, b)
    return y[:m] if m_pad != m else y


# --------------------------------------------------------------------------- #
# Attention kernel (one q tile; kx already projected and fully resident)       #
# --------------------------------------------------------------------------- #
def _make_attention_kernel(mb, k_len, block_q, embed_dim, hidden_dim, n_head,
                           out_dim, with_score, score_scale, mxu_dtype, precision):
    nh = n_head
    nh_hidden = n_head * hidden_dim

    def kernel(kx_ref, q_ref, wq_ref, bq_ref, wp_ref, bp_ref, out_ref, *score_refs):
        # ---- q projection: one flattened 2D MXU matmul per q tile ----
        q2d = q_ref[...].reshape(mb * block_q, embed_dim)
        qx2d = jnp.dot(q2d.astype(mxu_dtype), wq_ref[...].astype(mxu_dtype),
                       preferred_element_type=jnp.float32,
                       precision=precision) + bq_ref[...].astype(jnp.float32)

        # ---- split heads (trace-time skip for the default n_head == 1 path) ----
        if nh > 1:
            # TODO(synk): for n_head > 1 a head-major weight layout would make this a
            # free leading-dim reshape instead of a lane-crossing transpose.
            qx = qx2d.reshape(mb, block_q, nh, hidden_dim)
            qx = jnp.transpose(qx, (2, 0, 1, 3)).reshape(nh * mb, block_q, hidden_dim)
        else:
            qx = qx2d.reshape(mb, block_q, hidden_dim)

        kx = kx_ref[...]                                    # (nh*mb, k_len, hidden)

        # ---- dot-product scores ----
        score = jnp.einsum('bqd,bkd->bqk', qx.astype(mxu_dtype), kx.astype(mxu_dtype),
                           preferred_element_type=jnp.float32, precision=precision)
        if score_scale != 1.0:
            score = score * score_scale

        # ---- softmax over dim=0 (batch*head) exactly like F.softmax(score, dim=0);
        #      that axis is fully resident in every block -> no cross-block reduction.
        #      Exact divide (approx reciprocal caused the previous numeric failure). ----
        m = jnp.max(score, axis=0, keepdims=True)
        e = jnp.exp(score - m)
        p = e / jnp.sum(e, axis=0, keepdims=True)

        # ---- attend: p @ kx (kx reused as values, matching the module) ----
        att = jnp.einsum('bqk,bkd->bqd', p.astype(mxu_dtype), kx.astype(mxu_dtype),
                         preferred_element_type=jnp.float32, precision=precision)

        # ---- torch.cat(torch.split(output, mb, dim=0), dim=-1) ----
        if nh > 1:
            att = att.reshape(nh, mb, block_q, hidden_dim)
            att = jnp.transpose(att, (1, 2, 0, 3)).reshape(mb, block_q, nh_hidden)

        # ---- output projection (dropout p=0 -> identity), flattened 2D matmul ----
        out2d = jnp.dot(att.reshape(mb * block_q, nh_hidden).astype(mxu_dtype),
                        wp_ref[...].astype(mxu_dtype),
                        preferred_element_type=jnp.float32,
                        precision=precision) + bp_ref[...].astype(jnp.float32)
        out_ref[...] = out2d.reshape(mb, block_q, out_dim).astype(out_ref.dtype)
        if with_score:
            score_refs[0][...] = p.astype(score_refs[0].dtype)

    return kernel


def attention_forward(k, q, params, *, n_head=1, score_function='dot_product',
                      block_q=None, with_score=True, mxu_dtype=None,
                      out_dtype=None, score_dtype=None):
    # TODO(synk): score_function 'mlp' and 'bi_linear' and dropout p>0 are not translated.
    if q.ndim == 2:
        q = q[:, None, :]
    if k.ndim == 2:
        k = k[:, None, :]
    mb, k_len, embed_dim = k.shape
    q_len = q.shape[1]
    nh_hidden = params['wk'].shape[1]
    hidden_dim = nh_hidden // n_head
    out_dim = params['wp'].shape[1]

    if mxu_dtype is None:
        mxu_dtype = jnp.bfloat16 if q.dtype == jnp.bfloat16 else jnp.float32
    out_dtype = out_dtype or q.dtype
    score_dtype = score_dtype or q.dtype
    precision = (lax.Precision.HIGHEST if mxu_dtype == jnp.float32
                 else lax.Precision.DEFAULT)

    if score_function == 'dot_product':
        score_scale = 1.0
    elif score_function == 'scaled_dot_product':
        score_scale = 1.0 / math.sqrt(hidden_dim)
    else:
        raise NotImplementedError(f"score_function={score_function!r} not translated")

    # ---- K projection hoisted out of the per-q-tile kernel: computed exactly once ----
    kx2d = linear_forward(k.reshape(mb * k_len, embed_dim), params['wk'], params['bk'],
                          out_dtype=mxu_dtype, mxu_dtype=mxu_dtype, precision=precision)
    if n_head > 1:
        kx = kx2d.reshape(mb, k_len, n_head, hidden_dim)
        kx = jnp.transpose(kx, (2, 0, 1, 3)).reshape(n_head * mb, k_len, hidden_dim)
    else:
        kx = kx2d.reshape(mb, k_len, hidden_dim)

    # ---- q tiling: multiple-of-8 tiles, >=2 tiles when possible, pad (never one
    #      giant fallback block) ----
    if block_q is None:
        block_q = min(512, _round_up(-(-q_len // 2), 8)) if q_len >= 16 else 8
    block_q = max(8, _round_up(int(block_q), 8))
    block_q = min(block_q, _round_up(q_len, 8))
    q_len_pad = _round_up(q_len, block_q)
    if q_len_pad != q_len:
        q = jnp.pad(q, ((0, 0), (0, q_len_pad - q_len), (0, 0)))
    grid = (q_len_pad // block_q,)

    kernel = _make_attention_kernel(mb, k_len, block_q, embed_dim, hidden_dim,
                                    n_head, out_dim, with_score, score_scale,
                                    mxu_dtype, precision)

    in_specs = [
        pl.BlockSpec((n_head * mb, k_len, hidden_dim), lambda qi: (0, 0, 0)),  # kx (invariant)
        pl.BlockSpec((mb, block_q, embed_dim), lambda qi: (0, qi, 0)),         # q (tiled)
        pl.BlockSpec((embed_dim, nh_hidden), lambda qi: (0, 0)),               # wq
        pl.BlockSpec((1, nh_hidden), lambda qi: (0, 0)),                       # bq
        pl.BlockSpec((nh_hidden, out_dim), lambda qi: (0, 0)),                 # wp
        pl.BlockSpec((1, out_dim), lambda qi: (0, 0)),                         # bp
    ]
    out_spec_main = pl.BlockSpec((mb, block_q, out_dim), lambda qi: (0, qi, 0))
    out_shape_main = jax.ShapeDtypeStruct((mb, q_len_pad, out_dim), out_dtype)
    if with_score:
        out_specs = (out_spec_main,
                     pl.BlockSpec((n_head * mb, block_q, k_len), lambda qi: (0, qi, 0)))
        out_shapes = (out_shape_main,
                      jax.ShapeDtypeStruct((n_head * mb, q_len_pad, k_len), score_dtype))
    else:
        out_specs = out_spec_main
        out_shapes = out_shape_main

    isz = lambda a: jnp.dtype(a.dtype).itemsize
    flops = int(2 * mb * q_len_pad * embed_dim * nh_hidden
                + 4 * n_head * mb * q_len_pad * k_len * hidden_dim
                + 2 * mb * q_len_pad * nh_hidden * out_dim)
    transcendentals = int(n_head * mb * q_len_pad * k_len)
    bytes_accessed = int(
        kx.size * isz(kx) + q.size * isz(q)
        + sum(int(np.prod(params[n].shape)) * isz(params[n])
              for n in ('wq', 'bq', 'wp', 'bp'))
        + mb * q_len_pad * out_dim * jnp.dtype(out_dtype).itemsize
        + (n_head * mb * q_len_pad * k_len * jnp.dtype(score_dtype).itemsize
           if with_score else 0))

    res = pl.pallas_call(
        kernel,
        out_shape=out_shapes,
        grid=grid,
        in_specs=in_specs,
        out_specs=out_specs,
        compiler_params=pltpu.CompilerParams(
            dimension_semantics=("parallel",),           # q tiles are independent
            vmem_limit_bytes=_vmem_limit_bytes()),
        cost_estimate=pl.CostEstimate(flops=flops,
                                      transcendentals=transcendentals,
                                      bytes_accessed=bytes_accessed),
    )(kx, q, params['wq'], params['bq'], params['wp'], params['bp'])

    if with_score:
        out, score = res
        return out[:, :q_len], score[:, :q_len, :]
    return res[:, :q_len]


# --------------------------------------------------------------------------- #
# Parameter init + pure-JAX reference                                          #
# --------------------------------------------------------------------------- #
def init_params(key, embed_dim, hidden_dim, n_head, out_dim):
    """nn.Linear-style init: U(-1/sqrt(fan_in), 1/sqrt(fan_in)); W pre-transposed."""
    ks = jax.random.split(key, 6)
    bnd_kq = 1.0 / math.sqrt(embed_dim)
    bnd_p = 1.0 / math.sqrt(n_head * hidden_dim)
    return dict(
        wk=jax.random.uniform(ks[0], (embed_dim, n_head * hidden_dim), jnp.float32, -bnd_kq, bnd_kq),
        bk=jax.random.uniform(ks[1], (1, n_head * hidden_dim), jnp.float32, -bnd_kq, bnd_kq),
        wq=jax.random.uniform(ks[2], (embed_dim, n_head * hidden_dim), jnp.float32, -bnd_kq, bnd_kq),
        bq=jax.random.uniform(ks[3], (1, n_head * hidden_dim), jnp.float32, -bnd_kq, bnd_kq),
        wp=jax.random.uniform(ks[4], (n_head * hidden_dim, out_dim), jnp.float32, -bnd_p, bnd_p),
        bp=jax.random.uniform(ks[5], (1, out_dim), jnp.float32, -bnd_p, bnd_p),
    )


def reference_forward(k, q, params, n_head, hidden_dim):
    """Pure-JAX mirror of the PyTorch forward (true-f32 matmuls)."""
    mb, k_len, _ = k.shape
    q_len = q.shape[1]
    kx = jnp.matmul(k, params['wk'], precision='highest') + params['bk']
    kx = kx.reshape(mb, k_len, n_head, hidden_dim)
    kx = jnp.transpose(kx, (2, 0, 1, 3)).reshape(n_head * mb, k_len, hidden_dim)
    qx = jnp.matmul(q, params['wq'], precision='highest') + params['bq']
    qx = qx.reshape(mb, q_len, n_head, hidden_dim)
    qx = jnp.transpose(qx, (2, 0, 1, 3)).reshape(n_head * mb, q_len, hidden_dim)
    score = jnp.einsum('bqd,bkd->bqk', qx, kx, precision='highest')
    score = jax.nn.softmax(score, axis=0)
    out = jnp.einsum('bqk,bkd->bqd', score, kx, precision='highest')
    out = jnp.concatenate(jnp.split(out, n_head, axis=0), axis=-1)
    out = jnp.matmul(out, params['wp'], precision='highest') + params['bp']
    return out, score


if __name__ == "__main__":
    mb, k_len, q_len = 2, 8, 8
    embed_dim, n_head = 32, 1
    hidden_dim = embed_dim // n_head
    out_dim = embed_dim

    key = jax.random.PRNGKey(0)
    kk, kq, kp = jax.random.split(key, 3)
    k = jax.random.normal(kk, (mb, k_len, embed_dim), jnp.float32)
    q = jax.random.normal(kq, (mb, q_len, embed_dim), jnp.float32)
    params = init_params(kp, embed_dim, hidden_dim, n_head, out_dim)

    out, score = attention_forward(k, q, params, n_head=n_head, with_score=True)
    jax.block_until_ready((out, score))
    ref_out, ref_score = reference_forward(k, q, params, n_head, hidden_dim)
    np.testing.assert_allclose(np.asarray(out), np.asarray(ref_out), rtol=2e-3, atol=2e-3)
    np.testing.assert_allclose(np.asarray(score), np.asarray(ref_score), rtol=2e-3, atol=2e-3)

    # Also exercise the padded / multi-tile q path (q_len not a multiple of the tile).
    q2_len = 12
    q2 = jax.random.normal(jax.random.PRNGKey(1), (mb, q2_len, embed_dim), jnp.float32)
    out2, score2 = attention_forward(k, q2, params, n_head=n_head, with_score=True)
    jax.block_until_ready((out2, score2))
    ref_out2, ref_score2 = reference_forward(k, q2, params, n_head, hidden_dim)
    np.testing.assert_allclose(np.asarray(out2), np.asarray(ref_out2), rtol=2e-3, atol=2e-3)
    np.testing.assert_allclose(np.asarray(score2), np.asarray(ref_score2), rtol=2e-3, atol=2e-3)

    print("KERNEL_OK")
</pallas_src>

<mosaic_0001>
module attributes {stable_mosaic.version = 11 : i64} {
  func.func @kernel(%arg0: i32, %arg1: memref<16x32xf32, #tpu.memory_space<vmem>>, %arg2: memref<32x32xf32, #tpu.memory_space<vmem>>, %arg3: memref<1x32xf32, #tpu.memory_space<vmem>>, %arg4: memref<16x32xf32, #tpu.memory_space<vmem>>) attributes {dimension_semantics = [#tpu.dimension_semantics<parallel>], iteration_bounds = array<i64: 1>, scalar_prefetch = 0 : i64, scratch_operands = 0 : i64, tpu.core_type = #tpu.core_type<tc>, window_params = [{transform_indices = @transform_0, window_bounds = array<i64: 16, 32>}, {pipeline_mode = #tpu.pipeline_mode<synchronous>, transform_indices = @transform_1, window_bounds = array<i64: 32, 32>}, {pipeline_mode = #tpu.pipeline_mode<synchronous>, transform_indices = @transform_2, window_bounds = array<i64: 1, 32>}, {transform_indices = @transform_3, window_bounds = array<i64: 16, 32>}]} {
    %c0 = arith.constant 0 : index
    %c0_0 = arith.constant 0 : index
    %0 = vector.load %arg1[%c0, %c0_0] : memref<16x32xf32, #tpu.memory_space<vmem>>, vector<16x32xf32>
    %c0_1 = arith.constant 0 : index
    %c0_2 = arith.constant 0 : index
    %1 = vector.load %arg2[%c0_1, %c0_2] : memref<32x32xf32, #tpu.memory_space<vmem>>, vector<32x32xf32>
    %cst = arith.constant dense<0.000000e+00> : vector<16x32xf32>
    %2 = tpu.matmul %0, %1, %cst {dimension_numbers = #tpu.dot_dimension_numbers<[1], [0], [0], [1], [0, 0, 1, 1], [], []>, precision = #tpu.contract_precision<fp32>} : vector<16x32xf32>, vector<32x32xf32>, vector<16x32xf32> -> vector<16x32xf32>
    %c0_3 = arith.constant 0 : index
    %c0_4 = arith.constant 0 : index
    %3 = vector.load %arg3[%c0_3, %c0_4] : memref<1x32xf32, #tpu.memory_space<vmem>>, vector<1x32xf32>
    %4 = vector.broadcast %3 : vector<1x32xf32> to vector<16x32xf32>
    %5 = arith.addf %2, %4 : vector<16x32xf32>
    %c0_5 = arith.constant 0 : index
    %c0_6 = arith.constant 0 : index
    %6 = vector.load %arg4[%c0_5, %c0_6] : memref<16x32xf32, #tpu.memory_space<vmem>>, vector<16x32xf32>
    tpu.vector_store %arg4[%c0_5, %c0_6], %5 {strides = array<i32>} : memref<16x32xf32, #tpu.memory_space<vmem>>, vector<16x32xf32>,
    return
  }
  func.func @transform_0(%arg0: i32) -> (i32, i32) {
    %c0_i32 = arith.constant 0 : i32
    %c0_i32_0 = arith.constant 0 : i32
    return %arg0, %c0_i32 : i32, i32
  }
  func.func @transform_1(%arg0: i32) -> (i32, i32) {
    %c0_i32 = arith.constant 0 : i32
    %c0_i32_0 = arith.constant 0 : i32
    %c0_i32_1 = arith.constant 0 : i32
    return %c0_i32, %c0_i32_0 : i32, i32
  }
  func.func @transform_2(%arg0: i32) -> (i32, i32) {
    %c0_i32 = arith.constant 0 : i32
    %c0_i32_0 = arith.constant 0 : i32
    %c0_i32_1 = arith.constant 0 : i32
    return %c0_i32, %c0_i32_0 : i32, i32
  }
  func.func @transform_3(%arg0: i32) -> (i32, i32) {
    %c0_i32 = arith.constant 0 : i32
    %c0_i32_0 = arith.constant 0 : i32
    return %arg0, %c0_i32 : i32, i32
  }
}

</mosaic_0001>

<bundles_post_ra>
// kernel: tpu_custom_call.1
= control target key start
LH: loop header
LB: loop body
LE: loop exit
PB: predicated region body
PF: predicated region fallthrough
CT: control target
= control target key end

     0   :  { %8 = vsyncpa [#allocation3], 0  ;;  %s940_s0 = inlined_call_operand.hbm [shape: f32[16,32], index: 0, kind: input, shape index: {}]   ;;  %s941_s1 = inlined_call_operand.hbm [shape: f32[32,32], index: 1, kind: input, shape index: {}]   ;;  %s942_s2 = inlined_call_operand.vmem [shape: f32[1,32], index: 2, kind: input, shape index: {}]   ;;  %s943_s3 = inlined_call_operand.hbm [shape: f32[16,32], index: 3, kind: output, shape index: {}]  }
   0x1   :  { %9 = vsyncpa [#allocation6], 0 }
   0x2   :  { %10 = vsyncpa [#allocation4], 0  ;;  %s851_s12 = smov [#allocation2]   ;;  %s779_s16 = scalar_lea.hbm %s940_s0, 256 }
   0x3   :  { %s16_s13 = sshll.u32 %s851_s12, 4  ;;  %p780_p0 = scmp.ne.s32.totalorder %s940_s0, %s779_s16  ;;  %s17_s13 = int_to_ptr.vmem [resolvable:$true] %s16_s13 }
   0x4   :  { %p783_p1 = scmp.lt.u32.totalorder %s779_s16, %s940_s0 }
   0x6   :  { %p785_p2 = pnand %p783_p1, %p780_p0 }
   0x8   :  { %788 = shalt.err (!%p785_p2)
}
   0x9   :  { %s789_s21 = scalar_lea.vmem %s17_s13, 256  ;;  %p794_p4 = scmp.lt.s32.totalorder %s17_s13, %s17_s13 }
   0xa   :  { %p790_p3 = scmp.ne.s32.totalorder %s17_s13, %s789_s21  ;;  %p795_p5 = scmp.lt.s32.totalorder %s789_s21, %s789_s21 }
   0xc   :  { %p796_p6 = por %p795_p5, %p794_p4 }
   0xe   :  { %p797_p7 = pnand %p796_p6, %p790_p3 }
  0x10   :  { %800 = shalt.err (!%p797_p7)
}
  0x11   :  { %s852_s22 = smov 128   ;;  %s853_s23 = smov 8  }
  0x12   :  { %22 = dma.hbm_to_vmem [thread:$0]  %s940_s0, 256, %s17_s13, [#allocation3], %s852_s22, %s852_s22, %s853_s23  }
  0x13   :  { %s854_s26 = smov [#allocation5]   ;;  %s801_s30 = scalar_lea.hbm %s941_s1, 512 }
  0x14   :  { %s28_s27 = sshll.u32 %s854_s26, 4  ;;  %p802_p8 = scmp.ne.s32.totalorder %s941_s1, %s801_s30  ;;  %s29_s27 = int_to_ptr.vmem [resolvable:$true] %s28_s27 }
  0x15   :  { %p805_p9 = scmp.lt.u32.totalorder %s801_s30, %s941_s1 }
  0x17   :  { %p807_p10 = pnand %p805_p9, %p802_p8 }
  0x19   :  { %810 = shalt.err (!%p807_p10)
}
  0x1a   :  { %s811_s8 = scalar_lea.vmem %s29_s27, 512  ;;  %p816_p12 = scmp.lt.s32.totalorder %s29_s27, %s29_s27 }
  0x1b   :  { %p812_p11 = scmp.ne.s32.totalorder %s29_s27, %s811_s8  ;;  %p817_p13 = scmp.lt.s32.totalorder %s811_s8, %s811_s8 }
  0x1d   :  { %p818_p0 = por %p817_p13, %p816_p12 }
  0x1f   :  { %p819_p1 = pnand %p818_p0, %p812_p11 }
  0x21   :  { %822 = shalt.err (!%p819_p1)
}
  0x22   :  { %34 = dma.hbm_to_vmem [thread:$0]  %s941_s1, 512, %s29_s27, [#allocation6], %s852_s22, %s852_s22, %s853_s23  }
  0x23   :  { %845 = dma.done.wait [#allocation3], 256  }
  0x24   :  { %846 = vsyncadd [#allocation3], 4294967040 }
  0x25   :  { %847 = dma.done.wait [#allocation6], 512  }
  0x26   :  { %848 = vsyncadd [#allocation6], 4294966784  ;;  %vm56_vm0 = vcmask 261120   ;;  %v45_v0 = vld [vmem:[#allocation5] sm:$0xff]  ;;  %v46_v1 = vld [vmem:[#allocation5 + $0x8] sm:$0xff]  ;;  %s855_s11 = smov [#allocation7]  }
  0x27   :  { %v47_v2 = vld [vmem:[#allocation5 + $0x10] sm:$0xff]  ;;  %v64_v3 = vand.u32 4294901760, %v45_v0  ;;  %v67_v4 = vand.u32 4294901760, %v46_v1  ;;  %v48_v5 = vld [vmem:[#allocation5 + $0x18] sm:$0xff]  ;;  %s598_s12 = sshll.u32 %s855_s11, 4  ;;  %s599_s12 = int_to_ptr.vmem [resolvable:$true] %s598_s12 }
  0x28   :  { %v70_v6 = vand.u32 4294901760, %v47_v2  ;;  %v43_v7 = vld [vmem:[#allocation2] sm:$0xff]  ;;  %v44_v8 = vld [vmem:[#allocation2 + $0x8] sm:$0xff]  ;;  %v73_v9 = vand.u32 4294901760, %v48_v5  ;;  %s823_s13 = scalar_lea.vmem %s599_s12, 256  ;;  %p828_p3 = scmp.lt.s32.totalorder %s599_s12, %s599_s12 }
  0x29   :  { %v58_v10 = vsel %vm56_vm0, %v43_v7, 0  ;;  %v61_v11 = vsel %vm56_vm0, %v44_v8, 0  ;;  %v714_v12 = vpack.c.bf16 %v67_v4, %v64_v3  ;;  %v154_v15 = vsub.f32 %v45_v0, %v64_v3  ;;  %v611_v46 = vld [vmem:[%s942_s2] ss:$0 sm:$0xff]  ;;  %p824_p2 = scmp.ne.s32.totalorder %s599_s12, %s823_s13  ;;  %p829_p4 = scmp.lt.s32.totalorder %s823_s13, %s823_s13 }
  0x2a   :  { %v908_v13 = vand.u32 4294901760, %v58_v10  ;;  %v910_v14 = vand.u32 4294901760, %v61_v11  ;;  %v718_v16 = vpack.c.bf16 %v73_v9, %v70_v6  ;;  %v161_v17 = vsub.f32 %v46_v1, %v67_v4 }
  0x2b   :  { %v168_v18 = vsub.f32 %v47_v2, %v70_v6  ;;  %v175_v19 = vsub.f32 %v48_v5, %v73_v9  ;;  %715 = vmatprep.subr.bf16.mxu1 %v714_v12  ;;  %739 = vmatprep.subr.bf16.mxu0 %v714_v12  ;;  %v155_v22 = vand.u32 4294901760, %v154_v15  ;;  %p830_p5 = por %p829_p4, %p828_p3 }
  0x2c   :  { %v133_v20 = vsub.f32 %v58_v10, %v908_v13  ;;  %v143_v21 = vsub.f32 %v61_v11, %v910_v14  ;;  %717 = vmatpush3.bf16.msra.mxu1 %v714_v12  ;;  %741 = vmatpush3.bf16.msra.mxu0 %v714_v12  ;;  %v162_v23 = vand.u32 4294901760, %v161_v17  ;;  %v730_v44 = vpack.c.bf16 %v161_v17, %v154_v15 }
  0x2d   :  { %v169_v24 = vand.u32 4294901760, %v168_v18  ;;  %v176_v25 = vand.u32 4294901760, %v175_v19  ;;  %719 = vmatprep.subr.bf16.mxu1 %v718_v16  ;;  %743 = vmatprep.subr.bf16.mxu0 %v718_v16  ;;  %v156_v28 = vsub.f32 %v154_v15, %v155_v22  ;;  %v734_v45 = vpack.c.bf16 %v175_v19, %v168_v18  ;;  %p831_p6 = pnand %p830_p5, %p824_p2 }
  0x2e   :  { %v134_v26 = vand.u32 4294901760, %v133_v20  ;;  %v144_v27 = vand.u32 4294901760, %v143_v21  ;;  %v163_v29 = vsub.f32 %v161_v17, %v162_v23  ;;  %v746_v30 = vpack.c.bf16 %v162_v23, %v155_v22 }
  0x2f   :  { %v170_v31 = vsub.f32 %v168_v18, %v169_v24  ;;  %v177_v32 = vsub.f32 %v175_v19, %v176_v25  ;;  %v157_v35 = vand.u32 4294901760, %v156_v28  ;;  %v750_v43 = vpack.c.bf16 %v176_v25, %v169_v24 }
  0x30   :  { %v135_v33 = vsub.f32 %v133_v20, %v134_v26  ;;  %689 = vmatprep.mubr.f32.mxu0 %v134_v26  ;;  %v145_v34 = vsub.f32 %v143_v21, %v144_v27  ;;  %721 = vmatpush3.bf16.msra.mxu1 %v718_v16  ;;  %v164_v36 = vand.u32 4294901760, %v163_v29 }
  0x31   :  { %745 = vmatpush3.bf16.msra.mxu0 %v718_v16  ;;  %v171_v37 = vand.u32 4294901760, %v170_v31  ;;  %v178_v38 = vand.u32 4294901760, %v177_v32 }
  0x32   :  { %v136_v39 = vand.u32 4294901760, %v135_v33  ;;  %v146_v40 = vand.u32 4294901760, %v145_v34  ;;  %747 = vmatprep.subr.bf16.mxu0 %v746_v30  ;;  %v722_v41 = vpack.c.bf16 %v164_v36, %v157_v35 }
  0x33   :  { %v726_v42 = vpack.c.bf16 %v178_v38, %v171_v37 }
  0x34   :  { %656 = vmatprep.mubr.f32.mxu1 %v136_v39  ;;  %690 = vmatmul.mubr.f32.vlgmr.msra.gmra.mrb[0].mxu0 %v144_v27 }
  0x35   :  { %657 = vmatmul.mubr.f32.vlgmr.msra.gmra.mrb[0].mxu1 %v146_v40  ;;  %723 = vmatprep.subr.bf16.mxu1 %v722_v41 }
  0x36   :  { %725 = vmatpush3.bf16.msra.mxu1 %v722_v41  ;;  %749 = vmatpush3.bf16.msra.mxu0 %v746_v30 }
  0x37   :  { %727 = vmatprep.subr.bf16.mxu1 %v726_v42  ;;  %751 = vmatprep.subr.bf16.mxu0 %v750_v43 }
  0x38   :  { %667 = vmatprep.mubr.f32.mxu1 %v908_v13  ;;  %700 = vmatprep.mubr.f32.mxu0 %v908_v13 }
  0x3a   :  { %729 = vmatpush3.bf16.msra.mxu1 %v726_v42  ;;  %753 = vmatpush3.bf16.msra.mxu0 %v750_v43 }
  0x3b   :  { %731 = vmatprep.subr.bf16.mxu1 %v730_v44  ;;  %755 = vmatprep.subr.bf16.mxu0 %v714_v12 }
  0x3d   :  { %668 = vmatmul.mubr.f32.vlgmr.msra.gmra.mrb[0].mxu1 %v910_v14  ;;  %701 = vmatmul.mubr.f32.vlgmr.msra.gmra.mrb[0].mxu0 %v910_v14 }
  0x3e   :  { %733 = vmatpush3.bf16.msra.mxu1 %v730_v44  ;;  %757 = vmatpush3.bf16.msra.mxu0 %v714_v12 }
  0x3f   :  { %735 = vmatprep.subr.bf16.mxu1 %v734_v45  ;;  %759 = vmatprep.subr.bf16.mxu0 %v718_v16 }
  0x40   :  { %678 = vmatprep.mubr.f32.mxu1 %v133_v20  ;;  %711 = vmatprep.mubr.f32.mxu0 %v908_v13 }
  0x42   :  { %737 = vmatpush3.bf16.msra.mxu1 %v734_v45  ;;  %761 = vmatpush3.bf16.msra.mxu0 %v718_v16 }
  0x45   :  { %679 = vmatmul.mubr.f32.vlgmr.msra.gmra.mrb[0].mxu1 %v143_v21  ;;  %712 = vmatmul.mubr.f32.vlgmr.msra.gmra.mrb[0].mxu0 %v910_v14 }
 0x118   :  { %v680_v47 = vpop.f32.mrb[0].mxu1  ;;  %v713_v48 = vpop.f32.mrb[0].mxu0 }
 0x119   :  { %v762_v49 = vadd.f32 %v680_v47, %v611_v46  ;;  %v325_v50 = vpop.f32.mrb[1].mxu1  ;;  %v581_v51 = vpop.f32.mrb[1].mxu0 }
 0x11a   :  { %v764_v52 = vadd.f32 %v611_v46, %v325_v50 }
 0x11b   :  { %v763_v53 = vadd.f32 %v762_v49, %v713_v48 }
 0x11c   :  { %v765_v54 = vadd.f32 %v764_v52, %v581_v51 }
 0x11d   :  { %592 = vst.msk [vmem:[#allocation7 + $0x8] sm:$0xff] %vm56_vm0, %v763_v53 }
 0x11e   :  { %591 = vst.msk [vmem:[#allocation7] sm:$0xff] %vm56_vm0, %v765_v54 }
 0x11f   :  { %834 = shalt.err (!%p831_p6)
}
 0x120   :  { %s835_s15 = scalar_lea.hbm %s943_s3, 256 }
 0x121   :  { %p836_p7 = scmp.ne.s32.totalorder %s943_s3, %s835_s15  ;;  %p839_p8 = scmp.lt.u32.totalorder %s835_s15, %s943_s3 }
 0x123   :  { %p841_p9 = pnand %p839_p8, %p836_p7 }
 0x125   :  { %844 = shalt.err (!%p841_p9)
}
 0x126   :  { %604 = dma.vmem_to_hbm [thread:$0]  %s599_s12, 256, %s943_s3, [#allocation4], %s852_s22, %s852_s22, %s853_s23  }
 0x127   :  { %849 = dma.done.wait [#allocation4], 256  }
 0x128   :  { %850 = vsyncadd [#allocation4], 4294967040 }
 0x129   :  { %608 = vsyncpa [#allocation3], 1 }
 0x12a   :  { %609 = vsyncpa [#allocation6], 1 }
 0x12b   :  { %610 = vsyncpa [#allocation4], 1 }

</bundles_post_ra>
